<compile_context>
chip_gen: v6e
topology: v6e:2x2x1
jax: 0.10.0
libtpu: 0.0.40
codegen_flags: <defaults>
</compile_context>

<pallas_src>
import functools
import math

import jax
import jax.numpy as jnp
from jax import lax
from jax.experimental import pallas as pl
from jax.experimental.pallas import tpu as pltpu

LN_EPS = 1e-5
_INV_SQRT2 = 0.7071067811865476


def _round_up(x, m):
    return ((x + m - 1) // m) * m


def _nbytes(shape, dtype):
    return math.prod(shape) * jnp.dtype(dtype).itemsize


def _vmem_cap_bytes():
    # Real device VMEM capacity (64 MiB/TC on v7x, 128 MiB on v5e/v6e);
    # conservative fallback if the query is unavailable.
    try:
        return int(pltpu.get_tpu_info().vmem_capacity_bytes)
    except Exception:  # pragma: no cover
        return 64 << 20


def _vmem_limit(est_bytes):
    cap = _vmem_cap_bytes()
    limit = int(est_bytes * 1.25) + (4 << 20)
    limit = min(limit, cap - (8 << 20))      # never ask for more than the chip has
    return max(limit, 16 << 20)


# ----------------------------- kernels -----------------------------

def _hidden_kernel(feat_ref, gamma_ref, beta_ref, wd_ref, bd_ref, h_ref):
    """Pass 1: LayerNorm -> Linear(D->D) -> exact gelu, one row tile per step."""
    x = feat_ref[...].astype(jnp.float32)

    mu = jnp.mean(x, axis=-1, keepdims=True)
    xc = x - mu
    var = jnp.mean(xc * xc, axis=-1, keepdims=True)
    xn = xc * lax.rsqrt(var + LN_EPS)
    xn = xn * gamma_ref[...].astype(jnp.float32) + beta_ref[...].astype(jnp.float32)

    # Dense D->D on the MXU in the weight's native dtype, f32 accumulation.
    xn = xn.astype(wd_ref.dtype)
    h = jnp.dot(xn, wd_ref[...], preferred_element_type=jnp.float32)
    h = h + bd_ref[...].astype(jnp.float32)

    # Exact (erf-based) gelu, matching torch.nn.functional.gelu.
    h = 0.5 * h * (1.0 + lax.erf(h * _INV_SQRT2))

    h_ref[...] = h.astype(h_ref.dtype)


def _logits_kernel(h_ref, wo_ref, bo_ref, out_ref):
    """Pass 2: one (row tile, vocab tile) of the vocab projection."""
    acc = jnp.dot(h_ref[...], wo_ref[...], preferred_element_type=jnp.float32)
    out_ref[...] = (acc + bo_ref[...].astype(jnp.float32)).astype(out_ref.dtype)


# ----------------------------- wrappers -----------------------------

def prepare_masklm_params(ln_gamma, ln_beta, dense_w, dense_b, out_w, out_b, *, tn=1024):
    """One-time parameter prep (hoisted out of the per-call path).

    Transposes matmul weights into MXU-friendly [in, out] layouts and pads the
    vocab axis so it tiles evenly into lane-dense (multiple-of-128) tiles.
    Returns (params_dict, num_classes, tn_eff).
    """
    V, D = out_w.shape
    assert dense_w.shape == (D, D)
    if V <= tn:
        tn_eff, v_pad = V, V          # single vocab tile (may be <128 lanes: perf-only)
    else:
        tn_eff = tn
        v_pad = _round_up(V, tn_eff)

    wo_t = out_w.T                                              # [D, V]
    wo_p = wo_t if v_pad == V else jnp.pad(wo_t, ((0, 0), (0, v_pad - V)))
    bo_p = out_b if v_pad == V else jnp.pad(out_b, ((0, v_pad - V),))

    params = dict(
        gamma2=ln_gamma.reshape(1, D),
        beta2=ln_beta.reshape(1, D),
        wd_t=dense_w.T,                                         # [D_in, D_out]
        bd2=dense_b.reshape(1, D),
        wo_p=wo_p,                                              # [D, V_pad]
        bo2=bo_p.reshape(1, v_pad),
    )
    return params, V, tn_eff


@functools.partial(jax.jit, static_argnames=("num_classes", "tn", "tm", "out_dtype"))
def masklm_head(features, params, *, num_classes, tn, tm=512, out_dtype=None):
    """features: [N, D] -> logits [N, num_classes].

    `params` comes from prepare_masklm_params. The masked_tokens boolean gather
    (dynamic shape) is performed by the caller before this call.
    """
    gamma2, beta2 = params["gamma2"], params["beta2"]
    wd_t, bd2 = params["wd_t"], params["bd2"]
    wo_p, bo2 = params["wo_p"], params["bo2"]

    N, D = features.shape
    D2, V_pad = wo_p.shape
    assert D2 == D and V_pad % tn == 0
    if out_dtype is None:
        out_dtype = features.dtype
    out_dtype = jnp.dtype(out_dtype)

    # Hidden activations carry the vocab-weight dtype so the dominant matmul hits
    # the native MXU rate (bf16 weights -> bf16 inputs), f32 accumulation.
    h_dtype = wo_p.dtype

    # Row tiling: clip for small N and round to the sublane pack of the narrowest
    # dtype touched (8 rows f32, 16 bf16, 32 int8/fp8).
    min_isz = min(jnp.dtype(features.dtype).itemsize, jnp.dtype(h_dtype).itemsize)
    pack = 8 * (4 // min_isz)
    tm_eff = tm if N >= tm else _round_up(N, pack)
    n_pad = _round_up(N, tm_eff)
    feat_p = features if n_pad == N else jnp.pad(features, ((0, n_pad - N), (0, 0)))

    # ---------------- Pass 1: h = gelu(dense(LN(features))) ----------------
    est1 = (2 * _nbytes((tm_eff, D), feat_p.dtype)
            + 2 * (_nbytes((1, D), gamma2.dtype) + _nbytes((1, D), beta2.dtype)
                   + _nbytes((1, D), bd2.dtype))
            + 2 * _nbytes((D, D), wd_t.dtype)
            + 2 * _nbytes((tm_eff, D), h_dtype))
    cost1 = pl.CostEstimate(
        flops=2 * n_pad * D * D + 10 * n_pad * D,
        transcendentals=n_pad * D,
        bytes_accessed=(_nbytes((n_pad, D), feat_p.dtype)
                        + _nbytes((D, D), wd_t.dtype)
                        + _nbytes((n_pad, D), h_dtype)))

    h = pl.pallas_call(
        _hidden_kernel,
        out_shape=jax.ShapeDtypeStruct((n_pad, D), h_dtype),
        grid_spec=pltpu.PrefetchScalarGridSpec(
            num_scalar_prefetch=0,
            grid=(n_pad // tm_eff,),
            in_specs=[
                pl.BlockSpec((tm_eff, D), lambda i: (i, 0)),   # features row tile
                pl.BlockSpec((1, D), lambda i: (0, 0)),        # ln gamma
                pl.BlockSpec((1, D), lambda i: (0, 0)),        # ln beta
                pl.BlockSpec((D, D), lambda i: (0, 0)),        # dense weight [in, out]
                pl.BlockSpec((1, D), lambda i: (0, 0)),        # dense bias
            ],
            out_specs=pl.BlockSpec((tm_eff, D), lambda i: (i, 0)),
        ),
        compiler_params=pltpu.CompilerParams(
            dimension_semantics=("parallel",),
            vmem_limit_bytes=_vmem_limit(est1)),
        cost_estimate=cost1,
    )(feat_p, gamma2, beta2, wd_t, bd2)

    # ------- Pass 2: logits = h @ wo + bias  (vocab OUTER, rows INNER) -------
    # Vocab-outer grid => the (D, tn) weight tile is DMA'd once per vocab tile
    # (weight read once total), and any megacore split lands on the vocab axis.
    est2 = (2 * _nbytes((tm_eff, D), h_dtype)
            + 2 * _nbytes((D, tn), wo_p.dtype)
            + 2 * _nbytes((1, tn), bo2.dtype)
            + 2 * _nbytes((tm_eff, tn), out_dtype))
    cost2 = pl.CostEstimate(
        flops=2 * n_pad * V_pad * D,
        transcendentals=0,
        bytes_accessed=(_nbytes((D, V_pad), wo_p.dtype)
                        + (V_pad // tn) * _nbytes((n_pad, D), h_dtype)
                        + _nbytes((n_pad, V_pad), out_dtype)))

    out = pl.pallas_call(
        _logits_kernel,
        out_shape=jax.ShapeDtypeStruct((n_pad, V_pad), out_dtype),
        grid_spec=pltpu.PrefetchScalarGridSpec(
            num_scalar_prefetch=0,
            grid=(V_pad // tn, n_pad // tm_eff),               # vocab outer, rows inner
            in_specs=[
                pl.BlockSpec((tm_eff, D), lambda j, i: (i, 0)),   # hidden row tile
                pl.BlockSpec((D, tn), lambda j, i: (0, j)),       # vocab weight tile
                pl.BlockSpec((1, tn), lambda j, i: (0, j)),       # vocab bias tile
            ],
            out_specs=pl.BlockSpec((tm_eff, tn), lambda j, i: (i, j)),
        ),
        compiler_params=pltpu.CompilerParams(
            dimension_semantics=("parallel", "parallel"),
            vmem_limit_bytes=_vmem_limit(est2)),
        cost_estimate=cost2,
    )(h, wo_p, bo2)

    return out[:N, :num_classes]


def _reference(features, ln_gamma, ln_beta, dense_w, dense_b, out_w, out_b):
    x = features.astype(jnp.float32)
    mu = jnp.mean(x, axis=-1, keepdims=True)
    var = jnp.mean((x - mu) ** 2, axis=-1, keepdims=True)
    x = (x - mu) * lax.rsqrt(var + LN_EPS) * ln_gamma + ln_beta
    x = x @ dense_w.astype(jnp.float32).T + dense_b
    x = 0.5 * x * (1.0 + lax.erf(x / jnp.sqrt(2.0)))
    return x @ out_w.astype(jnp.float32).T + out_b


if __name__ == "__main__":
    key = jax.random.PRNGKey(0)

    # ---------- Test 1: module-implied small shapes, f32 path ----------
    B, T, D, V = 2, 8, 32, 64
    k_feat, k_g, k_b, k_wd, k_bd, k_wo = jax.random.split(key, 6)

    features_btd = jax.random.normal(k_feat, (B, T, D), dtype=jnp.float32)
    # masked_tokens selection is a boolean gather done outside the kernel
    # (masked_tokens=None case: all tokens), flattened to [N, D].
    features = features_btd.reshape(B * T, D)

    ln_gamma = jnp.ones((D,), jnp.float32) + 0.01 * jax.random.normal(k_g, (D,))
    ln_beta = 0.01 * jax.random.normal(k_b, (D,), dtype=jnp.float32)
    dense_w = 0.1 * jax.random.normal(k_wd, (D, D), dtype=jnp.float32)   # [out, in]
    dense_b = 0.1 * jax.random.normal(k_bd, (D,), dtype=jnp.float32)
    out_w = 0.1 * jax.random.normal(k_wo, (V, D), dtype=jnp.float32)      # [V, D]
    out_b = jnp.zeros((V,), jnp.float32)                                  # nn.Parameter(zeros)

    params, nc, tn = prepare_masklm_params(
        ln_gamma, ln_beta, dense_w, dense_b, out_w, out_b, tn=1024)
    logits = jax.block_until_ready(
        masklm_head(features, params, num_classes=nc, tn=tn))
    ref = _reference(features, ln_gamma, ln_beta, dense_w, dense_b, out_w, out_b)
    assert logits.shape == (B * T, V)
    assert jnp.allclose(logits, ref, rtol=1e-4, atol=1e-4), "f32 mismatch vs reference"

    # ---------- Test 2: bf16 weights/activations (native MXU path) ----------
    params_bf16, nc, tn = prepare_masklm_params(
        ln_gamma, ln_beta, dense_w.astype(jnp.bfloat16), dense_b,
        out_w.astype(jnp.bfloat16), out_b, tn=1024)
    logits_bf16 = jax.block_until_ready(
        masklm_head(features.astype(jnp.bfloat16), params_bf16,
                    num_classes=nc, tn=tn, out_dtype=jnp.float32))
    assert jnp.allclose(logits_bf16, ref, rtol=5e-2, atol=5e-2), "bf16 mismatch vs reference"

    # bf16 logits emission (halves writeback) — smoke check.
    logits_bf16_out = jax.block_until_ready(
        masklm_head(features.astype(jnp.bfloat16), params_bf16,
                    num_classes=nc, tn=tn, out_dtype=jnp.bfloat16))
    assert logits_bf16_out.dtype == jnp.bfloat16
    assert logits_bf16_out.shape == (B * T, V)

    # ---------- Test 3: multi-tile grid (vocab outer, rows inner) with padding ----------
    D3, V3, N3 = 128, 320, 20
    k_f3, k_w3, k_o3 = jax.random.split(jax.random.PRNGKey(1), 3)
    f3 = jax.random.normal(k_f3, (N3, D3), dtype=jnp.float32)
    g3 = jnp.ones((D3,), jnp.float32)
    b3 = jnp.zeros((D3,), jnp.float32)
    wd3 = 0.05 * jax.random.normal(k_w3, (D3, D3), dtype=jnp.float32)
    bd3 = 0.05 * jax.random.normal(k_w3, (D3,), dtype=jnp.float32)
    wo3 = 0.05 * jax.random.normal(k_o3, (V3, D3), dtype=jnp.float32)
    bo3 = jnp.zeros((V3,), jnp.float32)

    params3, nc3, tn3 = prepare_masklm_params(g3, b3, wd3, bd3, wo3, bo3, tn=128)
    logits3 = jax.block_until_ready(
        masklm_head(f3, params3, num_classes=nc3, tn=tn3, tm=8))
    ref3 = _reference(f3, g3, b3, wd3, bd3, wo3, bo3)
    assert logits3.shape == (N3, V3)
    assert jnp.allclose(logits3, ref3, rtol=1e-2, atol=1e-2), "tiled mismatch vs reference"

    print("KERNEL_OK")
</pallas_src>

<mosaic_0001>
module attributes {stable_mosaic.version = 11 : i64} {
  func.func @_logits_kernel(%arg0: i32, %arg1: i32, %arg2: memref<16x32xf32, #tpu.memory_space<vmem>>, %arg3: memref<32x64xf32, #tpu.memory_space<vmem>>, %arg4: memref<1x64xf32, #tpu.memory_space<vmem>>, %arg5: memref<16x64xf32, #tpu.memory_space<vmem>>) attributes {dimension_semantics = [#tpu.dimension_semantics<parallel>, #tpu.dimension_semantics<parallel>], iteration_bounds = array<i64: 1, 1>, scalar_prefetch = 0 : i64, scratch_operands = 0 : i64, tpu.core_type = #tpu.core_type<tc>, window_params = [{transform_indices = @transform_0, window_bounds = array<i64: 16, 32>}, {transform_indices = @transform_1, window_bounds = array<i64: 32, 64>}, {transform_indices = @transform_2, window_bounds = array<i64: 1, 64>}, {transform_indices = @transform_3, window_bounds = array<i64: 16, 64>}]} {
    %c0 = arith.constant 0 : index
    %c0_0 = arith.constant 0 : index
    %0 = vector.load %arg2[%c0, %c0_0] : memref<16x32xf32, #tpu.memory_space<vmem>>, vector<16x32xf32>
    %c0_1 = arith.constant 0 : index
    %c0_2 = arith.constant 0 : index
    %1 = vector.load %arg3[%c0_1, %c0_2] : memref<32x64xf32, #tpu.memory_space<vmem>>, vector<32x64xf32>
    %cst = arith.constant dense<0.000000e+00> : vector<16x64xf32>
    %2 = tpu.matmul %0, %1, %cst {dimension_numbers = #tpu.dot_dimension_numbers<[1], [0], [0], [1], [0, 0, 1, 1], [], []>} : vector<16x32xf32>, vector<32x64xf32>, vector<16x64xf32> -> vector<16x64xf32>
    %c0_3 = arith.constant 0 : index
    %c0_4 = arith.constant 0 : index
    %3 = vector.load %arg4[%c0_3, %c0_4] : memref<1x64xf32, #tpu.memory_space<vmem>>, vector<1x64xf32>
    %4 = vector.broadcast %3 : vector<1x64xf32> to vector<16x64xf32>
    %5 = arith.addf %2, %4 : vector<16x64xf32>
    %c0_5 = arith.constant 0 : index
    %c0_6 = arith.constant 0 : index
    %6 = vector.load %arg5[%c0_5, %c0_6] : memref<16x64xf32, #tpu.memory_space<vmem>>, vector<16x64xf32>
    tpu.vector_store %arg5[%c0_5, %c0_6], %5 {strides = array<i32>} : memref<16x64xf32, #tpu.memory_space<vmem>>, vector<16x64xf32>,
    return
  }
  func.func @transform_0(%arg0: i32, %arg1: i32) -> (i32, i32) {
    %c0_i32 = arith.constant 0 : i32
    %c0_i32_0 = arith.constant 0 : i32
    return %arg1, %c0_i32 : i32, i32
  }
  func.func @transform_1(%arg0: i32, %arg1: i32) -> (i32, i32) {
    %c0_i32 = arith.constant 0 : i32
    %c0_i32_0 = arith.constant 0 : i32
    return %c0_i32, %arg0 : i32, i32
  }
  func.func @transform_2(%arg0: i32, %arg1: i32) -> (i32, i32) {
    %c0_i32 = arith.constant 0 : i32
    %c0_i32_0 = arith.constant 0 : i32
    return %c0_i32, %arg0 : i32, i32
  }
  func.func @transform_3(%arg0: i32, %arg1: i32) -> (i32, i32) {
    %c0_i32 = arith.constant 0 : i32
    return %arg1, %arg0 : i32, i32
  }
}

module attributes {stable_mosaic.version = 11 : i64} {
  func.func @_hidden_kernel(%arg0: i32, %arg1: memref<16x32xf32, #tpu.memory_space<vmem>>, %arg2: memref<1x32xf32, #tpu.memory_space<vmem>>, %arg3: memref<1x32xf32, #tpu.memory_space<vmem>>, %arg4: memref<32x32xf32, #tpu.memory_space<vmem>>, %arg5: memref<1x32xf32, #tpu.memory_space<vmem>>, %arg6: memref<16x32xf32, #tpu.memory_space<vmem>>) attributes {dimension_semantics = [#tpu.dimension_semantics<parallel>], iteration_bounds = array<i64: 1>, scalar_prefetch = 0 : i64, scratch_operands = 0 : i64, tpu.core_type = #tpu.core_type<tc>, window_params = [{transform_indices = @transform_0, window_bounds = array<i64: 16, 32>}, {pipeline_mode = #tpu.pipeline_mode<synchronous>, transform_indices = @transform_1, window_bounds = array<i64: 1, 32>}, {pipeline_mode = #tpu.pipeline_mode<synchronous>, transform_indices = @transform_2, window_bounds = array<i64: 1, 32>}, {pipeline_mode = #tpu.pipeline_mode<synchronous>, transform_indices = @transform_3, window_bounds = array<i64: 32, 32>}, {pipeline_mode = #tpu.pipeline_mode<synchronous>, transform_indices = @transform_4, window_bounds = array<i64: 1, 32>}, {transform_indices = @transform_5, window_bounds = array<i64: 16, 32>}]} {
    %c0 = arith.constant 0 : index
    %c0_0 = arith.constant 0 : index
    %0 = vector.load %arg1[%c0, %c0_0] : memref<16x32xf32, #tpu.memory_space<vmem>>, vector<16x32xf32>
    %cst = arith.constant dense<0.000000e+00> : vector<16xf32>
    %1 = vector.multi_reduction <add>, %0, %cst [1] : vector<16x32xf32> to vector<16xf32>
    %2 = vector.shape_cast %1 : vector<16xf32> to vector<16x1xf32>
    %cst_1 = arith.constant 3.200000e+01 : f32
    %3 = vector.broadcast %cst_1 : f32 to vector<16x1xf32>
    %4 = arith.divf %2, %3 : vector<16x1xf32>
    %5 = vector.broadcast %4 : vector<16x1xf32> to vector<16x32xf32>
    %6 = arith.subf %0, %5 : vector<16x32xf32>
    %7 = arith.mulf %6, %6 : vector<16x32xf32>
    %cst_2 = arith.constant dense<0.000000e+00> : vector<16xf32>
    %8 = vector.multi_reduction <add>, %7, %cst_2 [1] : vector<16x32xf32> to vector<16xf32>
    %9 = vector.shape_cast %8 : vector<16xf32> to vector<16x1xf32>
    %cst_3 = arith.constant 3.200000e+01 : f32
    %10 = vector.broadcast %cst_3 : f32 to vector<16x1xf32>
    %11 = arith.divf %9, %10 : vector<16x1xf32>
    %cst_4 = arith.constant 9.99999974E-6 : f32
    %12 = vector.broadcast %cst_4 : f32 to vector<16x1xf32>
    %13 = arith.addf %11, %12 : vector<16x1xf32>
    %14 = math.rsqrt %13 : vector<16x1xf32>
    %15 = vector.broadcast %14 : vector<16x1xf32> to vector<16x32xf32>
    %16 = arith.mulf %6, %15 : vector<16x32xf32>
    %c0_5 = arith.constant 0 : index
    %c0_6 = arith.constant 0 : index
    %17 = vector.load %arg2[%c0_5, %c0_6] : memref<1x32xf32, #tpu.memory_space<vmem>>, vector<1x32xf32>
    %18 = vector.broadcast %17 : vector<1x32xf32> to vector<16x32xf32>
    %19 = arith.mulf %16, %18 : vector<16x32xf32>
    %c0_7 = arith.constant 0 : index
    %c0_8 = arith.constant 0 : index
    %20 = vector.load %arg3[%c0_7, %c0_8] : memref<1x32xf32, #tpu.memory_space<vmem>>, vector<1x32xf32>
    %21 = vector.broadcast %20 : vector<1x32xf32> to vector<16x32xf32>
    %22 = arith.addf %19, %21 : vector<16x32xf32>
    %c0_9 = arith.constant 0 : index
    %c0_10 = arith.constant 0 : index
    %23 = vector.load %arg4[%c0_9, %c0_10] : memref<32x32xf32, #tpu.memory_space<vmem>>, vector<32x32xf32>
    %cst_11 = arith.constant dense<0.000000e+00> : vector<16x32xf32>
    %24 = tpu.matmul %22, %23, %cst_11 {dimension_numbers = #tpu.dot_dimension_numbers<[1], [0], [0], [1], [0, 0, 1, 1], [], []>} : vector<16x32xf32>, vector<32x32xf32>, vector<16x32xf32> -> vector<16x32xf32>
    %c0_12 = arith.constant 0 : index
    %c0_13 = arith.constant 0 : index
    %25 = vector.load %arg5[%c0_12, %c0_13] : memref<1x32xf32, #tpu.memory_space<vmem>>, vector<1x32xf32>
    %26 = vector.broadcast %25 : vector<1x32xf32> to vector<16x32xf32>
    %27 = arith.addf %24, %26 : vector<16x32xf32>
    %cst_14 = arith.constant 5.000000e-01 : f32
    %28 = vector.broadcast %cst_14 : f32 to vector<16x32xf32>
    %29 = arith.mulf %28, %27 : vector<16x32xf32>
    %cst_15 = arith.constant 0.707106769 : f32
    %30 = vector.broadcast %cst_15 : f32 to vector<16x32xf32>
    %31 = arith.mulf %27, %30 : vector<16x32xf32>
    %32 = math.erf %31 : vector<16x32xf32>
    %cst_16 = arith.constant 1.000000e+00 : f32
    %33 = vector.broadcast %cst_16 : f32 to vector<16x32xf32>
    %34 = arith.addf %33, %32 : vector<16x32xf32>
    %35 = arith.mulf %29, %34 : vector<16x32xf32>
    %c0_17 = arith.constant 0 : index
    %c0_18 = arith.constant 0 : index
    %36 = vector.load %arg6[%c0_17, %c0_18] : memref<16x32xf32, #tpu.memory_space<vmem>>, vector<16x32xf32>
    tpu.vector_store %arg6[%c0_17, %c0_18], %35 {strides = array<i32>} : memref<16x32xf32, #tpu.memory_space<vmem>>, vector<16x32xf32>,
    return
  }
  func.func @transform_0(%arg0: i32) -> (i32, i32) {
    %c0_i32 = arith.constant 0 : i32
    %c0_i32_0 = arith.constant 0 : i32
    return %arg0, %c0_i32 : i32, i32
  }
  func.func @transform_1(%arg0: i32) -> (i32, i32) {
    %c0_i32 = arith.constant 0 : i32
    %c0_i32_0 = arith.constant 0 : i32
    %c0_i32_1 = arith.constant 0 : i32
    return %c0_i32, %c0_i32_0 : i32, i32
  }
  func.func @transform_2(%arg0: i32) -> (i32, i32) {
    %c0_i32 = arith.constant 0 : i32
    %c0_i32_0 = arith.constant 0 : i32
    %c0_i32_1 = arith.constant 0 : i32
    return %c0_i32, %c0_i32_0 : i32, i32
  }
  func.func @transform_3(%arg0: i32) -> (i32, i32) {
    %c0_i32 = arith.constant 0 : i32
    %c0_i32_0 = arith.constant 0 : i32
    %c0_i32_1 = arith.constant 0 : i32
    return %c0_i32, %c0_i32_0 : i32, i32
  }
  func.func @transform_4(%arg0: i32) -> (i32, i32) {
    %c0_i32 = arith.constant 0 : i32
    %c0_i32_0 = arith.constant 0 : i32
    %c0_i32_1 = arith.constant 0 : i32
    return %c0_i32, %c0_i32_0 : i32, i32
  }
  func.func @transform_5(%arg0: i32) -> (i32, i32) {
    %c0_i32 = arith.constant 0 : i32
    %c0_i32_0 = arith.constant 0 : i32
    return %arg0, %c0_i32 : i32, i32
  }
}

</mosaic_0001>

<bundles_post_ra>
// kernel: masklm_head.2
= control target key start
LH: loop header
LB: loop body
LE: loop exit
PB: predicated region body
PF: predicated region fallthrough
CT: control target
= control target key end

     0   :  { %10 = vsyncpa [#allocation3], 0  ;;  %s380_s0 = inlined_call_operand.hbm [shape: f32[16,32], index: 0, kind: input, shape index: {}]   ;;  %s381_s1 = inlined_call_operand.vmem [shape: f32[1,32], index: 1, kind: input, shape index: {}]   ;;  %s382_s2 = inlined_call_operand.vmem [shape: f32[1,32], index: 2, kind: input, shape index: {}]   ;;  %s383_s3 = inlined_call_operand.hbm [shape: f32[32,32], index: 3, kind: input, shape index: {}]   ;;  %s384_s4 = inlined_call_operand.hbm [shape: f32[1,32], index: 4, kind: input, shape index: {}]   ;;  %s385_s5 = inlined_call_operand.vmem [shape: f32[16,32], index: 5, kind: output, shape index: {}]  }
   0x1   :  { %11 = vsyncpa [#allocation5], 0  ;;  %s316_s18 = smov [#allocation4]   ;;  %s317_s20 = smov [#allocation2]  }
   0x2   :  { %s33_s19 = sshll.u32 %s316_s18, 4  ;;  %s17_s21 = sshll.u32 %s317_s20, 4  ;;  %s34_s19 = int_to_ptr.vmem [resolvable:$true] %s33_s19  ;;  %s18_s21 = int_to_ptr.vmem [resolvable:$true] %s17_s21 }
   0x3   :  { %s260_s22 = scalar_lea.vmem %s34_s19, 512  ;;  %p265_p1 = scmp.lt.s32.totalorder %s34_s19, %s34_s19 }
   0x4   :  { %p261_p0 = scmp.ne.s32.totalorder %s34_s19, %s260_s22  ;;  %p266_p2 = scmp.lt.s32.totalorder %s260_s22, %s260_s22 }
   0x6   :  { %p267_p3 = por %p266_p2, %p265_p1 }
   0x8   :  { %p268_p4 = pnand %p267_p3, %p261_p0 }
   0xa   :  { %271 = shalt.err (!%p268_p4)
}
   0xb   :  { %s318_s23 = smov 128   ;;  %s319_s24 = smov 8  }
   0xc   :  { %39 = dma.hbm_to_vmem [thread:$0]  %s383_s3, 512, %s34_s19, [#allocation5], %s318_s23, %s318_s23, %s319_s24  }
   0xd   :  { %s280_s27 = scalar_lea.vmem %s18_s21, 256  ;;  %p285_p6 = scmp.lt.s32.totalorder %s18_s21, %s18_s21 }
   0xe   :  { %p281_p5 = scmp.ne.s32.totalorder %s18_s21, %s280_s27  ;;  %p286_p7 = scmp.lt.s32.totalorder %s280_s27, %s280_s27 }
  0x10   :  { %p287_p8 = por %p286_p7, %p285_p6 }
  0x12   :  { %p288_p9 = pnand %p287_p8, %p281_p5 }
  0x14   :  { %291 = shalt.err (!%p288_p9)
}
  0x15   :  { %23 = dma.hbm_to_vmem [thread:$0]  %s380_s0, 256, %s18_s21, [#allocation3], %s318_s23, %s318_s23, %s319_s24  }
  0x16   :  { %s320_s30 = smov [#allocation6]  }
  0x17   :  { %s46_s6 = sshll.u32 %s320_s30, 4  ;;  %s47_s6 = int_to_ptr.vmem [resolvable:$true] %s46_s6 }
  0x18   :  { %s300_s7 = scalar_lea.vmem %s47_s6, 16  ;;  %s304_s8 = scalar_lea.vmem %s47_s6, 32 }
  0x19   :  { %p301_p10 = scmp.ne.s32.totalorder %s47_s6, %s300_s7  ;;  %p305_p11 = scmp.lt.s32.totalorder %s47_s6, %s47_s6 }
  0x1a   :  { %p306_p12 = scmp.lt.s32.totalorder %s304_s8, %s300_s7 }
  0x1c   :  { %p307_p13 = por %p306_p12, %p305_p11 }
  0x1e   :  { %p308_p0 = pnand %p307_p13, %p301_p10 }
  0x20   :  { %311 = shalt.err (!%p308_p0)
}
  0x21   :  { %49 = dma.hbm_to_vmem [thread:$0]  %s384_s4, 16, %s47_s6, [#allocation5]  }
  0x22   :  { %312 = dma.done.wait [#allocation3], 256  }
  0x23   :  { %313 = vsyncadd [#allocation3], 4294967040 }
  0x24   :  { %314 = dma.done.wait [#allocation5], 528  }
  0x25   :  { %315 = vsyncadd [#allocation5], 4294966768  ;;  %vm61_vm0 = vcmask 261120   ;;  %v59_v0 = vld [vmem:[#allocation2] sm:$0xff]  ;;  %v60_v1 = vld [vmem:[#allocation2 + $0x8] sm:$0xff] }
  0x26   :  { %v62_v2 = vsel %vm61_vm0, %v59_v0, 0.0  ;;  %v65_v3 = vsel %vm61_vm0, %v60_v1, 0.0  ;;  %v110_v14 = vld [vmem:[#allocation4 + $0x18] sm:$0xff]  ;;  %v109_v15 = vld [vmem:[#allocation4 + $0x10] sm:$0xff]  ;;  %v108_v16 = vld [vmem:[#allocation4 + $0x8] sm:$0xff] }
  0x27   :  { %63 = vadd.xlane.f32.xlu0 %v62_v2  ;;  %228 = vmatprep.subr.mxu0 %v110_v14  ;;  %v107_v17 = vld [vmem:[#allocation4] sm:$0xff]  ;;  %v217_v25 = vld [vmem:[%s381_s1] ss:$0 sm:$0xff] }
  0x28   :  { %229 = vmatpush3.msra.mxu0 %v110_v14  ;;  %v218_v27 = vld [vmem:[%s382_s2] ss:$0 sm:$0xff]  ;;  %v219_v34 = vld [vmem:[#allocation6] ss:$0 sm:$0xff] }
  0x29   :  { %230 = vmatprep.subr.mxu0 %v109_v15 }
  0x2a   :  { %231 = vmatpush3.msra.mxu0 %v109_v15 }
  0x2b   :  { %66 = vadd.xlane.f32.xlu0 %v65_v3  ;;  %232 = vmatprep.subr.mxu0 %v108_v16 }
  0x2c   :  { %233 = vmatpush3.msra.mxu0 %v108_v16 }
  0x2d   :  { %234 = vmatprep.subr.mxu0 %v107_v17 }
  0x2e   :  { %235 = vmatpush3.msra.mxu0 %v107_v17 }
  0xb0   :  { %v64_v4 = vpop.xlane.xlu0 %63 }
  0xb1   :  { %v69_v5 = vmul.f32 0.03125, %v64_v4 }
  0xb3   :  { %v71_v6 = vsub.f32 %v59_v0, %v69_v5 }
  0xb4   :  { %v67_v7 = vpop.xlane.xlu0 %66 }
  0xb5   :  { %v70_v8 = vmul.f32 0.03125, %v67_v7  ;;  %v73_v9 = vmul.f32 %v71_v6, %v71_v6 }
  0xb7   :  { %v72_v10 = vsub.f32 %v60_v1, %v70_v8  ;;  %v75_v11 = vsel %vm61_vm0, %v73_v9, 0.0 }
  0xb8   :  { %76 = vadd.xlane.f32.xlu1 %v75_v11 }
  0xb9   :  { %v74_v12 = vmul.f32 %v72_v10, %v72_v10 }
  0xbb   :  { %v78_v13 = vsel %vm61_vm0, %v74_v12, 0.0 }
  0xbc   :  { %79 = vadd.xlane.f32.xlu1 %v78_v13 }
 0x141   :  { %v77_v18 = vpop.xlane.xlu1 %76 }
 0x142   :  { %v81_v19 = vmul.f32 0.03125, %v77_v18 }
 0x144   :  { %v83_v20 = vadd.f32 1e-05, %v81_v19 }
 0x145   :  { %v80_v21 = vpop.xlane.xlu1 %79 }
 0x146   :  { %244 = vrsqrt.f32 %v83_v20  ;;  %v82_v22 = vmul.f32 0.03125, %v80_v21 }
 0x148   :  { %v84_v23 = vadd.f32 1e-05, %v82_v22 }
 0x14a   :  { %246 = vrsqrt.f32 %v84_v23 }
 0x153   :  { %v245_v24 = vpop.eup %244 }
 0x154   :  { %v87_v26 = vmul.f32 %v245_v24, %v71_v6 }
 0x156   :  { %v96_v28 = vmul.f32 %v217_v25, %v87_v26 }
 0x157   :  { %v247_v29 = vpop.eup %246 }
 0x158   :  { %v88_v30 = vmul.f32 %v247_v29, %v72_v10  ;;  %v105_v31 = vadd.f32 %v218_v27, %v96_v28 }
 0x15a   :  { %v97_v32 = vmul.f32 %v217_v25, %v88_v30  ;;  %236 = vmatprep.mubr.msk.f32.mxu0 %vm61_vm0, %v105_v31 }
 0x15c   :  { %v106_v33 = vadd.f32 %v218_v27, %v97_v32 }
 0x15e   :  { %237 = vmatmul.mubr.msk.f32.vlgmr.msra.gmra.mxu0 %vm61_vm0, %v106_v33 }
 0x21e   :  { %v238_v35 = vpop.f32.mrf.mxu0 }
 0x21f   :  { %v196_v36 = vadd.f32 %v238_v35, %v219_v34 }
 0x220   :  { %v190_v37 = vpop.f32.mrf.mxu0 }
 0x221   :  { %v202_v38 = vmul.f32 0.70710677, %v196_v36  ;;  %v191_v39 = vadd.f32 %v219_v34, %v190_v37  ;;  %v200_v42 = vmul.f32 0.5, %v196_v36 }
 0x223   :  { %248 = verf.f32 %v202_v38  ;;  %v201_v40 = vmul.f32 0.70710677, %v191_v39  ;;  %v199_v46 = vmul.f32 0.5, %v191_v39 }
 0x225   :  { %250 = verf.f32 %v201_v40 }
 0x230   :  { %v249_v41 = vpop.eup %248 }
 0x231   :  { %v206_v43 = vadd.f32 1.0, %v249_v41 }
 0x232   :  { %v251_v44 = vpop.eup %250 }
 0x233   :  { %v208_v45 = vmul.f32 %v206_v43, %v200_v42  ;;  %v205_v47 = vadd.f32 1.0, %v251_v44 }
 0x235   :  { %210 = vst.msk [vmem:[%s385_s5 + $0x8] sm:$0xff] %vm61_vm0, %v208_v45  ;;  %v207_v48 = vmul.f32 %v205_v47, %v199_v46 }
 0x237   :  { %209 = vst.msk [vmem:[%s385_s5] sm:$0xff] %vm61_vm0, %v207_v48 }
 0x238   :  { %215 = vsyncpa [#allocation3], 1 }
 0x239   :  { %216 = vsyncpa [#allocation5], 1 }

// kernel: masklm_head.3
= control target key start
LH: loop header
LB: loop body
LE: loop exit
PB: predicated region body
PF: predicated region fallthrough
CT: control target
= control target key end

     0   :  { %vm28_vm0 = vcmask 261120   ;;  %s221_s0 = inlined_call_operand.vmem [shape: f32[16,32], index: 0, kind: input, shape index: {}]   ;;  %s222_s1 = inlined_call_operand.vmem [shape: f32[32,64], index: 1, kind: input, shape index: {}]   ;;  %s223_s2 = inlined_call_operand.vmem [shape: f32[1,64], index: 2, kind: input, shape index: {}]   ;;  %s224_s3 = inlined_call_operand.hbm [shape: f32[16,64], index: 3, kind: output, shape index: {}]  }
   0x1   :  { %v20_v0 = vld [vmem:[%s222_s1 + $0x18] sm:$0xff]  ;;  %v19_v1 = vld [vmem:[%s222_s1 + $0x10] sm:$0xff]  ;;  %v15_v2 = vld [vmem:[%s221_s0] sm:$0xff] }
   0x2   :  { %138 = vmatprep.subr.mxu0 %v20_v0  ;;  %v18_v3 = vld [vmem:[%s222_s1 + $0x8] sm:$0xff]  ;;  %146 = vmatprep.mubr.msk.f32.mxu0 %vm28_vm0, %v15_v2 }
   0x3   :  { %139 = vmatpush3.msra.mxu0 %v20_v0 }
   0x4   :  { %8 = vsyncpa [#allocation3], 0  ;;  %140 = vmatprep.subr.mxu0 %v19_v1  ;;  %v17_v4 = vld [vmem:[%s222_s1] sm:$0xff]  ;;  %v16_v5 = vld [vmem:[%s221_s0 + $0x8] sm:$0xff]  ;;  %s174_s26 = smov [#allocation2]   ;;  %vm110_vm1 = vcmask 523264  }
   0x5   :  { %141 = vmatpush3.msra.mxu0 %v19_v1  ;;  %v129_v6 = vld [vmem:[%s223_s2] ss:$0 sm:$0xff]  ;;  %s118_s27 = sshll.u32 %s174_s26, 4  ;;  %s119_s27 = int_to_ptr.vmem [resolvable:$true] %s118_s27 }
   0x6   :  { %142 = vmatprep.subr.mxu0 %v18_v3  ;;  %s152_s1 = scalar_lea.vmem %s119_s27, 256  ;;  %p157_p1 = scmp.lt.s32.totalorder %s119_s27, %s119_s27 }
   0x7   :  { %143 = vmatpush3.msra.mxu0 %v18_v3  ;;  %p153_p0 = scmp.ne.s32.totalorder %s119_s27, %s152_s1  ;;  %p158_p2 = scmp.lt.s32.totalorder %s152_s1, %s152_s1 }
   0x8   :  { %144 = vmatprep.subr.mxu0 %v17_v4 }
   0x9   :  { %145 = vmatpush3.msra.mxu0 %v17_v4  ;;  %p159_p3 = por %p158_p2, %p157_p1 }
   0xa   :  { %147 = vmatmul.mubr.msk.f32.vlgmr.msra.gmra.mxu0 %vm28_vm0, %v16_v5 }
   0xb   :  { %p160_p4 = pnand %p159_p3, %p153_p0 }
  0xca   :  { %v148_v7 = vpop.f32.mrf.mxu0 }
  0xcb   :  { %v107_v8 = vadd.f32 %v148_v7, %v129_v6 }
  0xcc   :  { %v101_v9 = vpop.f32.mrf.mxu0 }
  0xcd   :  { %112 = vst.msk [vmem:[#allocation2 + $0x8] sm:$0xff] %vm110_vm1, %v107_v8  ;;  %v102_v10 = vadd.f32 %v129_v6, %v101_v9 }
  0xcf   :  { %111 = vst.msk [vmem:[#allocation2] sm:$0xff] %vm110_vm1, %v102_v10 }
  0xd0   :  { %163 = shalt.err (!%p160_p4)
}
  0xd1   :  { %s175_s0 = smov 128   ;;  %s176_s28 = smov 8  }
  0xd2   :  { %124 = dma.vmem_to_hbm [thread:$0]  %s119_s27, 256, %s224_s3, [#allocation3], %s175_s0, %s175_s0, %s176_s28  }
  0xd3   :  { %172 = dma.done.wait [#allocation3], 256  }
  0xd4   :  { %173 = vsyncadd [#allocation3], 4294967040 }
  0xd5   :  { %128 = vsyncpa [#allocation3], 1 }

</bundles_post_ra>
